<compile_context>
chip_gen: v5e
topology: v5e:2x2
jax: 0.10.0
libtpu: 0.0.40
codegen_flags: <defaults>
</compile_context>

<pallas_src>
import math

import jax
import jax.numpy as jnp
from jax.experimental import pallas as pl
from jax.experimental.pallas import tpu as pltpu

_DEFAULT_EPS = 1e-10


def _make_l2norm_kernel(eps):
    eps = float(eps)

    def kernel(x_ref, w_ref, o_ref):
        # x_ref: (1, C, TS)   w_ref: (C, 1)   o_ref: (1, C, TS)
        x = x_ref[...].astype(jnp.float32)
        ss = jnp.sum(x * x, axis=1, keepdims=True)            # (1, 1, TS) channel reduce
        # Per-lane exact reciprocal (C x fewer ops than dividing the full block).
        inv = pl.reciprocal(jnp.sqrt(ss) + eps, approx=False)  # (1, 1, TS)
        w = w_ref[...].astype(jnp.float32)[None, :, :]          # (1, C, 1)
        # TODO(synk): on v7x with bf16 inputs the final scale could stay in bf16
        # to trim VPU work; kept in f32 for v5e compatibility / parity.
        o_ref[...] = ((x * inv) * w).astype(o_ref.dtype)

    return kernel


def _sublane_multiple(itemsize):
    # f32 -> 8 sublanes per vreg, bf16 -> 16, int8 -> 32 (sub-32-bit packs).
    return max(8, 32 // max(1, itemsize))


def _pick_spatial_tile(channels, spatial_padded, itemsize, n_batches,
                       cap_bytes=1 << 20):
    """Lane-dense spatial tile.

    - counts the *sublane-padded* channel extent so the VMEM estimate is real,
    - prefers a TS that evenly divides the padded spatial extent (no ragged
      tail tile / masked stores),
    - shrinks TS when the grid would otherwise be too small to feed both
      TensorCores on v7x.
    """
    sub = _sublane_multiple(itemsize)
    padded_c = -(-channels // sub) * sub

    max_lanes = cap_bytes // max(1, padded_c * itemsize)
    max_lanes = max(128, (max_lanes // 128) * 128)
    max_lanes = min(max_lanes, spatial_padded)

    ts = None
    for cand in range(max_lanes, 127, -128):
        if spatial_padded % cand == 0:
            ts = cand
            break
    if ts is None:
        ts = max_lanes

    # Ensure a few grid steps for megacore sharding when N is tiny.
    while n_batches * (spatial_padded // ts) < 4 and ts > 128 and ts % 256 == 0:
        ts //= 2

    return ts, padded_c


def l2norm_pallas(x, weight, eps=_DEFAULT_EPS):
    """Equivalent of L2Norm(n_channels, scale)(x).

    x:      (N, C, *spatial)  -- e.g. (N, C, D, H, W)
    weight: (C,)              -- per-channel scale (gamma)
    """
    n, c = x.shape[0], x.shape[1]
    s = int(math.prod(x.shape[2:])) if x.ndim > 2 else 1
    assert weight.shape == (c,), weight.shape

    x3 = x.reshape(n, c, s)

    # Pad the spatial axis to a multiple of 128 -> lane-dense blocks, capped tiles.
    s_pad = max(128, ((s + 127) // 128) * 128)
    if s_pad != s:
        x3 = jnp.pad(x3, ((0, 0), (0, 0), (0, s_pad - s)))

    w2 = weight.reshape(c, 1)
    itemsize = jnp.dtype(x.dtype).itemsize

    ts, padded_c = _pick_spatial_tile(c, s_pad, itemsize, n)
    grid = (n, s_pad // ts)

    # Explicit scoped-VMEM budget: double-buffered in + out blocks, the f32
    # intermediates materialized in the kernel, the weight buffer and slack.
    block_bytes = padded_c * ts * itemsize
    f32_block = padded_c * ts * 4
    vmem_need = 4 * block_bytes + 3 * f32_block + (1 << 20)
    vmem_limit = int(min(32 << 20, max(vmem_need, 4 << 20)))

    out3 = pl.pallas_call(
        _make_l2norm_kernel(eps),
        out_shape=jax.ShapeDtypeStruct((n, c, s_pad), x.dtype),
        grid_spec=pltpu.PrefetchScalarGridSpec(
            num_scalar_prefetch=0,
            grid=grid,
            in_specs=[
                pl.BlockSpec((1, c, ts), lambda i, j: (i, 0, j)),
                pl.BlockSpec((c, 1), lambda i, j: (0, 0)),
            ],
            out_specs=pl.BlockSpec((1, c, ts), lambda i, j: (i, 0, j)),
        ),
        compiler_params=pltpu.CompilerParams(
            dimension_semantics=("parallel", "parallel"),
            vmem_limit_bytes=vmem_limit,
        ),
    )(x3, w2)

    if s_pad != s:
        out3 = out3[:, :, :s]
    return out3.reshape(x.shape)


def _reference(x, weight, eps=_DEFAULT_EPS):
    norm = jnp.sqrt(jnp.sum(x * x, axis=1, keepdims=True)) + eps
    wshape = (1, weight.shape[0]) + (1,) * (x.ndim - 2)
    return weight.reshape(wshape) * (x / norm)


if __name__ == "__main__":
    key = jax.random.PRNGKey(0)
    k1, k2 = jax.random.split(key)

    scale = 20.0  # gamma; reset_parameters() fills weight with this constant

    # Case 1: 5-D input matching the module's weight.unsqueeze(0..4):
    # (batch=2, channels=4, depth=2, height=8, width=8) -> spatial = 128 lanes.
    b, c, d, h, w = 2, 4, 2, 8, 8
    x1 = jax.random.normal(k1, (b, c, d, h, w), dtype=jnp.float32)
    w1 = jnp.full((c,), scale, dtype=jnp.float32)
    out1 = jax.block_until_ready(l2norm_pallas(x1, w1))
    ref1 = _reference(x1, w1)
    assert out1.shape == x1.shape and out1.dtype == x1.dtype
    assert bool(jnp.allclose(out1, ref1, rtol=1e-6, atol=1e-6)), float(
        jnp.max(jnp.abs(out1 - ref1))
    )

    # Case 2: spatial not a multiple of 128 -> exercises the pad/crop path.
    b2, c2, d2, h2, w2_ = 1, 4, 3, 5, 5  # spatial = 75
    x2 = jax.random.normal(k2, (b2, c2, d2, h2, w2_), dtype=jnp.float32)
    w2 = jnp.full((c2,), scale, dtype=jnp.float32)
    out2 = jax.block_until_ready(l2norm_pallas(x2, w2))
    ref2 = _reference(x2, w2)
    assert out2.shape == x2.shape and out2.dtype == x2.dtype
    assert bool(jnp.allclose(out2, ref2, rtol=1e-6, atol=1e-6)), float(
        jnp.max(jnp.abs(out2 - ref2))
    )

    print("KERNEL_OK")
</pallas_src>

<mosaic_0001>
module attributes {stable_mosaic.version = 11 : i64} {
  func.func @kernel(%arg0: i32, %arg1: i32, %arg2: memref<1x4x128xf32, #tpu.memory_space<vmem>>, %arg3: memref<4x1xf32, #tpu.memory_space<vmem>>, %arg4: memref<1x4x128xf32, #tpu.memory_space<vmem>>) attributes {dimension_semantics = [#tpu.dimension_semantics<parallel>, #tpu.dimension_semantics<parallel>], iteration_bounds = array<i64: 2, 1>, scalar_prefetch = 0 : i64, scratch_operands = 0 : i64, tpu.core_type = #tpu.core_type<tc>, window_params = [{transform_indices = @transform_0, window_bounds = array<i64: 1, 4, 128>}, {pipeline_mode = #tpu.pipeline_mode<synchronous>, transform_indices = @transform_1, window_bounds = array<i64: 4, 1>}, {transform_indices = @transform_2, window_bounds = array<i64: 1, 4, 128>}]} {
    %c0 = arith.constant 0 : index
    %c0_0 = arith.constant 0 : index
    %c0_1 = arith.constant 0 : index
    %0 = vector.load %arg2[%c0, %c0_0, %c0_1] : memref<1x4x128xf32, #tpu.memory_space<vmem>>, vector<1x4x128xf32>
    %1 = arith.mulf %0, %0 : vector<1x4x128xf32>
    %cst = arith.constant dense<0.000000e+00> : vector<1x128xf32>
    %2 = vector.multi_reduction <add>, %1, %cst [1] : vector<1x4x128xf32> to vector<1x128xf32>
    %3 = vector.shape_cast %2 : vector<1x128xf32> to vector<1x1x128xf32>
    %4 = math.sqrt %3 : vector<1x1x128xf32>
    %cst_2 = arith.constant 1.000000e-10 : f32
    %5 = vector.broadcast %cst_2 : f32 to vector<1x1x128xf32>
    %6 = arith.addf %4, %5 : vector<1x1x128xf32>
    %7 = tpu.reciprocal %6 : vector<1x1x128xf32> -> vector<1x1x128xf32>
    %c0_3 = arith.constant 0 : index
    %c0_4 = arith.constant 0 : index
    %8 = vector.load %arg3[%c0_3, %c0_4] : memref<4x1xf32, #tpu.memory_space<vmem>>, vector<4x1xf32>
    %9 = vector.shape_cast %8 : vector<4x1xf32> to vector<1x4x1xf32>
    %10 = vector.broadcast %7 : vector<1x1x128xf32> to vector<1x4x128xf32>
    %11 = arith.mulf %0, %10 : vector<1x4x128xf32>
    %12 = vector.broadcast %9 : vector<1x4x1xf32> to vector<1x4x128xf32>
    %13 = arith.mulf %11, %12 : vector<1x4x128xf32>
    %c0_5 = arith.constant 0 : index
    %c0_6 = arith.constant 0 : index
    %c0_7 = arith.constant 0 : index
    %14 = vector.load %arg4[%c0_5, %c0_6, %c0_7] : memref<1x4x128xf32, #tpu.memory_space<vmem>>, vector<1x4x128xf32>
    tpu.vector_store %arg4[%c0_5, %c0_6, %c0_7], %13 {strides = array<i32>} : memref<1x4x128xf32, #tpu.memory_space<vmem>>, vector<1x4x128xf32>,
    return
  }
  func.func @transform_0(%arg0: i32, %arg1: i32) -> (i32, i32, i32) {
    %c0_i32 = arith.constant 0 : i32
    %c0_i32_0 = arith.constant 0 : i32
    return %arg0, %c0_i32, %arg1 : i32, i32, i32
  }
  func.func @transform_1(%arg0: i32, %arg1: i32) -> (i32, i32) {
    %c0_i32 = arith.constant 0 : i32
    %c0_i32_0 = arith.constant 0 : i32
    %c0_i32_1 = arith.constant 0 : i32
    return %c0_i32, %c0_i32_0 : i32, i32
  }
  func.func @transform_2(%arg0: i32, %arg1: i32) -> (i32, i32, i32) {
    %c0_i32 = arith.constant 0 : i32
    %c0_i32_0 = arith.constant 0 : i32
    return %arg0, %c0_i32, %arg1 : i32, i32, i32
  }
}

</mosaic_0001>

<bundles_post_ra>
// kernel: tpu_custom_call.1
= control target key start
LH: loop header
LB: loop body
LE: loop exit
PB: predicated region body
PF: predicated region fallthrough
CT: control target
= control target key end

     0   :  { %7 = vsyncpa [#allocation3], 0  ;;  %s659_s0 = inlined_call_operand.hbm [shape: f32[2,4,128], index: 0, kind: input, shape index: {}]   ;;  %s660_s1 = inlined_call_operand.vmem [shape: f32[4,1], index: 1, kind: input, shape index: {}]   ;;  %s661_s2 = inlined_call_operand.hbm [shape: f32[2,4,128], index: 2, kind: output, shape index: {}]  }
   0x1   :  { %9 = vsyncpa [#allocation3 + $0x1], 0 }
   0x2   :  { %10 = vsyncpa [#allocation4], 0 }
   0x3   :  { %12 = vsyncpa [#allocation4 + $0x1], 0  ;;  %s532_s9 = smov 0   ;;  %s534_s10 = smov 0  }
   0x4   :  { %s536_s11 = smov 0   ;;  %s538_s12 = smov 0  }
   0x5   :  { %s540_s13 = smov 0   ;;  %s542_s14 = smov 0  }
   0x6 LB: > { %s321_s15 = sadd.s32 4294967295, %s514_s14   ;;  %s322_s16 = sadd.s32 4294967294, %s514_s14   ;;  %s514_s14 = sphi %s542_s14, %s18_s14   ;;  %s510_s13 = sphi %s540_s13, %s670_s13   ;;  %s506_s12 = sphi %s538_s12, %s669_s12   ;;  %s502_s11 = sphi %s536_s11, %s668_s11   ;;  %s498_s10 = sphi %s534_s10, %s667_s10   ;;  %s494_s9 = sphi %s532_s9, %s666_s9  }
   0x7   : > { %s30_s17 = sadd.s32 1, %s510_s13  ;;  %s39_s18 = sadd.s32 1, %s502_s11 }
   0x8   : > { %p32_p0 = scmp.ge.s32.totalorder %s30_s17, 2  ;;  %p46_p1 = scmp.ne.s32.totalorder %s502_s11, %s498_s10 }
   0x9   : > { %p47_p2 = scmp.eq.s32.totalorder %s514_s14, 0  ;;  %p52_p3 = scmp.ne.s32.totalorder %s498_s10, %s494_s9 }
   0xa   : > { %s672_s17 = smov (%p32_p0, %s30_s17), 0  ;;  %p53_p5 = scmp.eq.s32.totalorder %s321_s15, 0 }
   0xb   : > { %p573_p4 = por %p47_p2, %p46_p1  ;;  %s34_s20 = ssub.s32 %s510_s13, %s672_s17 }
   0xc   : > { %p99_p6 = scmp.eq.s32.totalorder %s321_s15, 1  ;;  %p37_p7 = scmp.eq.s32.totalorder %s34_s20, 0 }
   0xd   : > { %p579_p8 = por %p53_p5, %p52_p3  ;;  %p105_p10 = scmp.eq.s32.totalorder %s322_s16, 1 }
   0xe   : > { %p583_p9 = por %p99_p6, %p46_p1  ;;  %p324_p12 = scmp.ge.s32.totalorder %s514_s14, 2 }
   0xf   : > { %s588_s23 = scalar_select %p37_p7, %s502_s11, %s39_s18  }
  0x10   : > { %p590_p11 = por %p105_p10, %p52_p3  ;;  %p346_p13 = scmp.lt.s32.totalorder %s514_s14, 2 }
  0x11   : > { %s128_s25 = sand.u32 1, %s502_s11   ;;  %s326_s27 = sshll.u32 %s510_s13, 2 }
  0x12   : > { %s325_s26 = sshll.u32 %s128_s25, 2  ;;  %s137_s30 = scalar_lea.hbm %s659_s0, %s326_s27 }
  0x13   : > { %s132_s3 = scalar_lea.vmem [#allocation2], %s325_s26  ;;  %s139_s5 = sshll.u32 %s137_s30, 4  ;;  %s140_s5 = int_to_ptr.hbm [resolvable:$true] %s139_s5 }
  0x14   : > { %s141_s4 = sshll.u32 %s132_s3, 4  ;;  %p339_p0 = pnand %p346_p13, %p573_p4  ;;  %s142_s4 = int_to_ptr.vmem [resolvable:$true] %s141_s4 }
  0x15   : > { %p327_p1 = scmp.ge.s32.totalorder %s514_s14, 1  ;;  %p146_p2 = scmp.lt.s32.totalorder %s514_s14, 3 }
  0x16   : > { %s129_s6 = scalar_lea.sflag [#allocation3], %s128_s25 }
  0x17   : > { %341 = dma.hbm_to_vmem [thread:$0]  (!%p339_p0), %s140_s5, 64, %s142_s4, %s129_s6  }
  0x18   : > { %p147_p3 = pnand %p327_p1, %p146_p2 }
  0x19   : > { %s606_s7 = sand.u32 (!%p147_p3), 1, %s498_s10  }
  0x1a   : > { %150 = sbr.rel (%p147_p3) target bundleno = 154 (0x9a), region = 28  ;;  %s328_s8 = sshll.u32 (!%p147_p3), %s606_s7, 2 }
  0x1b   : > { %s153_s15 = scalar_lea.sflag (!%p147_p3), [#allocation3], %s606_s7  ;;  %s156_s16 = scalar_lea.vmem (!%p147_p3), [#allocation2], %s328_s8 }
  0x1f   : > { %485 = dma.done.wait (%p579_p8), %s153_s15, 64  }
  0x20   : > { %487 = vsyncadd (%p579_p8), %s153_s15, 4294967232  ;;  %v516_v0 = vmov 0   ;;  %v215_v1 = vld [vmem:[%s660_s1] sm:$0xf]  ;;  %vm180_vm0 = vcmask 1043456   ;;  %s331_s20 = sshll.u32 %s506_s12, 2 }
  0x21   : > { %397 = vset.pattern.permute.xlu0 %v516_v0  ;;  %v178_v2 = vld [vmem:[%s156_s16] sm:$0xf]  ;;  %s236_s26 = scalar_lea.hbm %s661_s2, %s331_s20  ;;  %s177_s27 = scalar_lea.vmem [#allocation5], %s328_s8 }
  0x22   : > { %219 = vperm.xlu0 %397, %v215_v1   ;;  %v179_v3 = vmul.f32 %v178_v2, %v178_v2  ;;  %s238_s28 = sshll.u32 %s177_s27, 4  ;;  %s240_s29 = sshll.u32 %s236_s26, 4  ;;  %s239_s28 = int_to_ptr.vmem [resolvable:$true] %s238_s28  ;;  %s241_s29 = int_to_ptr.hbm [resolvable:$true] %s240_s29 }
  0x23   : > { %s225_s30 = scalar_lea.sflag [#allocation4], %s606_s7  ;;  %s446_s3 = sshra.s32 %s241_s29, 4  ;;  %s447_s3 = int_to_ptr.hbm [resolvable:$true] %s446_s3 }
  0x24   : > { %v181_v4 = vsel %vm180_vm0, %v179_v3, 0.0  ;;  %s448_s12 = scalar_lea.hbm %s447_s3, 4  ;;  %s452_s6 = scalar_lea.hbm %s661_s2, 8 }
  0x25   : > { %v182_v5 = vrot.slane %v181_v4, 4  ;;  %p449_p4 = scmp.ne.s32.totalorder %s447_s3, %s448_s12  ;;  %p453_p7 = scmp.lt.s32.totalorder %s447_s3, %s661_s2 }
  0x26   : > { %p454_p8 = scmp.lt.s32.totalorder %s452_s6, %s448_s12 }
  0x27   : > { %v183_v6 = vadd.f32 %v182_v5, %v181_v4  ;;  %p450_p5 = pnand %p449_p4, %p583_p9 }
  0x28   : > { %p455_p10 = por %p454_p8, %p453_p7 }
  0x29   : > { %v184_v7 = vrot.slane %v183_v6, 2  ;;  %p451_p6 = pneg %p450_p5 }
  0x2b   : > { %v185_v8 = vadd.f32 %v184_v7, %v183_v6  ;;  %p456_p13 = pnand %p455_p10, %p451_p6 }
  0x2d   : > { %v186_v9 = vrot.slane %v185_v8, 1 }
  0x2f   : > { %v187_v10 = vadd.f32 %v186_v9, %v185_v8 }
  0x31   : > { %398 = vrsqrt.f32 %v187_v10  ;;  %vm195_vm1 = vcmp.eq.f32.partialorder %v187_v10, inf  ;;  %v198_v18 = vand.u32 2147483648, %v187_v10  ;;  %vm197_vm2 = vcmp.eq.f32.partialorder %v187_v10, 0.0 }
  0x37   : > { %v399_v11 = vpop.eup %398 }
  0x38   : > { %v189_v12 = vmul.f32 %v399_v11, %v187_v10 }
  0x3a   : > { %v190_v13 = vmul.f32 %v399_v11, %v189_v12 }
  0x3c   : > { %v191_v14 = vmul.f32 0.5, %v190_v13 }
  0x3e   : > { %v192_v15 = vsub.f32 1.5, %v191_v14 }
  0x40   : > { %v193_v16 = vmul.f32 %v399_v11, %v192_v15 }
  0x42   : > { %v194_v17 = vmul.f32 %v193_v16, %v187_v10 }
  0x44   : > { %v196_v19 = vsel %vm195_vm1, %v187_v10, %v194_v17 }
  0x45   : > { %v199_v20 = vsel %vm197_vm2, %v198_v18, %v196_v19 }
  0x46   : > { %v200_v21 = vadd.f32 1e-10, %v199_v20 }
  0x48   : > { %400 = vrcp.f32 %v200_v21  ;;  %vm206_vm3 = vweird.f32 %v200_v21  ;;  %v212_v26 = vand.u32 2147483648, %v200_v21  ;;  %v210_v28 = vand.u32 2147483647, %v200_v21 }
  0x4a   : > { %v213_v29 = vor.u32 1.1754944e-38, %v212_v26  ;;  %vm211_vm6 = vcmp.eq.f32.partialorder %v210_v28, 8.507059e+37 }
  0x4e   : > { %v401_v22 = vpop.eup %400 }
  0x4f   : > { %v202_v23 = vmul.f32 %v401_v22, %v200_v21  ;;  %vm207_vm4 = vweird.f32 %v401_v22 }
  0x50   : > { %vm208_vm5 = vmor %vm206_vm3, %vm207_vm4 }
  0x51   : > { %v203_v24 = vsub.f32 1.0, %v202_v23 }
  0x53   : > { %v204_v25 = vmul.f32 %v401_v22, %v203_v24 }
  0x55   : > { %v205_v27 = vadd.f32 %v401_v22, %v204_v25 }
  0x57   : > { %v209_v30 = vsel %vm208_vm5, %v401_v22, %v205_v27 }
  0x58   : > { %v214_v31 = vsel %vm211_vm6, %v213_v29, %v209_v30 }
  0x59   : > { %v216_v32 = vmul.f32 %v214_v31, %v178_v2 }
  0x94   : > { %v220_v33 = vpop.permute.xlu0 %219 }
  0x95   : > { %v222_v34 = vmul.f32 %v220_v33, %v216_v32 }
  0x97   : > { %223 = vst [vmem:[%s177_s27] sm:$0xf] %v222_v34 }
  0x98   : > { %459 = shalt.err (!%p456_p13)
}
  0x99   : > { %336 = dma.vmem_to_hbm [thread:$0]  (%p583_p9), %s239_s28, 64, %s241_s29, %s225_s30  }
  0x9a PF: > { %s252_s7 = sand.u32 1, %s494_s9   ;;  %p343_p0 = pnand %p324_p12, %p590_p11 }
  0x9b   : > { %s253_s16 = scalar_lea.sflag [#allocation4], %s252_s7 }
  0x9c   : > { %p344_p1 = pneg %p343_p0 }
  0x9e   : > { %489 = dma.done.wait (%p344_p1), %s253_s16, 64  }
  0x9f   : > { %491 = vsyncadd (%p344_p1), %s253_s16, 4294967232  ;;  %s18_s14 = sadd.s32 1, %s514_s14   ;;  %s666_s9 = smov %s498_s10 }
  0xa0   : > { %p15_p2 = scmp.ge.s32.totalorder %s18_s14, 4   ;;  %s667_s10 = smov %s502_s11 }
  0xa1   : > { %s668_s11 = smov %s588_s23  ;;  %s669_s12 = smov %s510_s13 }
  0xa2   : > { %s670_s13 = smov %s672_s17  ;;  %17 = sbr.rel (!%p15_p2) target bundleno = 6 (0x6), region = 73 }
  0xa7   :  { %259 = vsyncpa [#allocation3], 1 }
  0xa8   :  { %261 = vsyncpa [#allocation3 + $0x1], 1 }
  0xa9   :  { %262 = vsyncpa [#allocation4], 1 }
  0xaa   :  { %264 = vsyncpa [#allocation4 + $0x1], 1 }

</bundles_post_ra>
